<compile_context>
chip_gen: v7x
topology: tpu7x:2x2x1
jax: 0.10.0
libtpu: 0.0.40
codegen_flags: <defaults>
</compile_context>

<pallas_src>
import functools

import jax
import jax.numpy as jnp
from jax import lax
from jax.experimental import pallas as pl
from jax.experimental.pallas import tpu as pltpu


def _round_up(n: int, m: int) -> int:
    return ((n + m - 1) // m) * m


def _cdiv(a: int, b: int) -> int:
    return -(-a // b)


@functools.lru_cache(maxsize=1)
def _tpu_limits():
    """(physical VMEM bytes per core, TensorCores per chip), with safe fallbacks."""
    phys = None
    try:
        info = pltpu.get_tpu_info()
        for attr in ("vmem_capacity_bytes", "vmem_bytes", "vmem_size_bytes"):
            val = getattr(info, attr, None)
            if val:
                phys = int(val)
                break
    except Exception:
        pass
    kind = ""
    try:
        kind = jax.devices()[0].device_kind.lower()
    except Exception:
        pass
    is_v7 = ("v7" in kind) or ("7x" in kind)
    if phys is None:
        # Conservative (v7x-sized) assumption only when detection fails entirely.
        phys = (128 << 20) if (kind and not is_v7) else (64 << 20)
    n_tc = 2 if (is_v7 or phys <= (64 << 20)) else 1
    return phys, n_tc


def _make_spec(block_shape, index_map, buffers=None):
    """BlockSpec with an optional explicit buffer count (graceful fallback)."""
    if buffers is not None and hasattr(pl, "Buffered"):
        try:
            return pl.BlockSpec(block_shape, index_map,
                                pipeline_mode=pl.Buffered(buffers))
        except Exception:
            pass
    return pl.BlockSpec(block_shape, index_map)


def _mlp_kernel_out1(x_ref, w0_ref, b0_ref, w1t_ref, b1_ref, o_ref):
    """Regression head (out_feats == 1). o_ref is a lane-dense (1, TILE_B) row."""
    # In-kernel cast of the streamed operand (no extra HBM pass in the wrapper).
    x = x_ref[...].astype(w0_ref.dtype)
    # Hidden layer: MXU matmul, f32 accumulate, f32 epilogue (bias + ReLU).
    h = jnp.dot(x, w0_ref[...], preferred_element_type=jnp.float32)
    h = jnp.maximum(h + b0_ref[...].astype(jnp.float32), 0.0)
    # Output layer: contract (1, Hp) with (TILE_B, Hp) over Hp -> (1, TILE_B).
    # Keeps the stored output lane-dense (unmasked full-lane stores) instead of
    # a (TILE_B, 1) column that lowers to masked vst.msk partial stores.
    h = h.astype(w1t_ref.dtype)  # cast down only right before the 2nd matmul
    out = lax.dot_general(
        w1t_ref[...], h,
        dimension_numbers=(((1,), (1,)), ((), ())),
        preferred_element_type=jnp.float32)
    o_ref[...] = (out + b1_ref[...].astype(jnp.float32)).astype(o_ref.dtype)


def _mlp_kernel_general(x_ref, w0_ref, b0_ref, w1_ref, b1_ref, o_ref):
    """Generic head (out_feats >= 2): standard (TILE_B, out_feats) output tile."""
    x = x_ref[...].astype(w0_ref.dtype)
    h = jnp.dot(x, w0_ref[...], preferred_element_type=jnp.float32)
    h = jnp.maximum(h + b0_ref[...].astype(jnp.float32), 0.0)
    h = h.astype(w1_ref.dtype)
    out = jnp.dot(h, w1_ref[...], preferred_element_type=jnp.float32)
    o_ref[...] = (out + b1_ref[...].astype(jnp.float32)).astype(o_ref.dtype)


def mlp_forward(x, w0, b0, w1, b1, *, tile_b=None, compute_dtype=None,
                x_buffers=None):
    """Fused MLP forward.

    x:  (B, in_feats)
    w0: (in_feats, hidden)   b0: (1, hidden)
    w1: (hidden, out_feats)  b1: (1, out_feats)
    returns (B, out_feats) in x's original dtype.

    tile_b: optional override for batch rows per grid step. Default (None):
            chosen so the x block is ~2 MiB of raw HBM per DMA, clamped by the
            VMEM budget (padding-aware) and split across TensorCores on 2-TC chips.
    compute_dtype: optionally run the matmuls in e.g. bf16. Only the (small,
            VMEM-resident) weights are cast in the wrapper; x is cast in-kernel
            and biases / accumulation / stored output stay float32.
    x_buffers: optional pipeline depth for the x stream (default Pallas double
            buffering); try 3 if DMA latency is exposed for tiny in_feats.
    """
    B, in_feats = x.shape
    hidden = w0.shape[1]
    out_feats = w1.shape[1]
    out_dtype = x.dtype  # output precision independent of compute_dtype

    # Cast only the weights (small, resident); biases stay f32; x is cast in-kernel.
    if compute_dtype is not None:
        w0 = w0.astype(compute_dtype)
        w1 = w1.astype(compute_dtype)
    b0 = b0.astype(jnp.float32)
    b1 = b1.astype(jnp.float32)

    x_itemsize = jnp.dtype(x.dtype).itemsize
    w_itemsize = jnp.dtype(w0.dtype).itemsize
    out_itemsize = jnp.dtype(out_dtype).itemsize

    # Pad hidden (lane axis of the intermediate) to a multiple of 128: exact
    # (padded columns are relu(0+0)=0 and padded w1 rows are 0).
    hp = _round_up(hidden, 128)
    if hp != hidden:
        w0 = jnp.pad(w0, ((0, 0), (0, hp - hidden)))
        b0 = jnp.pad(b0, ((0, 0), (0, hp - hidden)))
        w1 = jnp.pad(w1, ((0, hp - hidden), (0, 0)))
    # NOTE: x / in_feats is deliberately NOT padded in HBM — that would add a
    # full extra pass over the dominant (memory-bound) input stream. A block
    # whose last dim equals the full array dim is legal; Mosaic pads lanes in VMEM.

    phys_vmem, n_tc = _tpu_limits()
    vmem_cap = (phys_vmem * 3) // 4  # ~48 MiB on v7x, ~96 MiB on v5e/v6e

    # ---- Mosaic-padded VMEM footprints (last dim -> 128 lanes, 2nd-last -> sublanes).
    def lanes(n):
        return _round_up(max(n, 1), 128)

    def subl(n, itemsize):
        return _round_up(max(n, 1), max(32 // itemsize, 8))

    # Grid-invariant operands: single-buffered (pl.Buffered(1)).
    w0_vmem = subl(in_feats, w_itemsize) * hp * w_itemsize
    b0_vmem = subl(1, 4) * hp * 4
    if out_feats == 1:
        w1_vmem = subl(1, w_itemsize) * hp * w_itemsize          # (1, hp) row
        b1_vmem = subl(1, 4) * lanes(1) * 4
    else:
        w1_vmem = subl(hp, w_itemsize) * lanes(out_feats) * w_itemsize
        b1_vmem = subl(1, 4) * lanes(out_feats) * 4
    fixed_vmem = w0_vmem + b0_vmem + w1_vmem + b1_vmem + (4 << 20)  # + scratch headroom

    # Per-batch-row VMEM cost: streamed x (multi-buffered), f32 hidden intermediate
    # (+ a down-cast copy when computing in bf16), and the double-buffered output tile.
    n_x_buf = max(x_buffers or 2, 2)
    x_row = n_x_buf * lanes(in_feats) * x_itemsize
    h_row = hp * 4 + (hp * w_itemsize if w_itemsize < 4 else 0)
    if out_feats == 1:
        out_row = 2 * 8 * out_itemsize          # (8-sublane, tile_b) output block
    else:
        out_row = 2 * lanes(out_feats) * out_itemsize
    per_row = x_row + h_row + out_row

    b_padded8 = _round_up(B, 8)
    budget_rows = max((vmem_cap - fixed_vmem) // per_row, 8)

    if tile_b is None:
        target_dma_bytes = 2 << 20               # ~2 MiB raw HBM per x block
        tile_target = max(target_dma_bytes // max(in_feats * x_itemsize, 1), 256)
        if n_tc >= 2 and b_padded8 >= 256:       # keep both v7x TensorCores busy
            tile_target = min(tile_target, _round_up(_cdiv(B, n_tc), 128))
    else:
        tile_target = int(tile_b)

    tb = max(min(tile_target, budget_rows, b_padded8), 8)
    if tb >= b_padded8:
        tb = b_padded8                            # single tile: multiple of 8 suffices
    else:
        tb = max((tb // 128) * 128, 128)          # multi-tile: 128-aligned blocks

    bp = _round_up(B, tb)
    if bp != B:
        x = jnp.pad(x, ((0, bp - B), (0, 0)))
    num_tiles = bp // tb

    vmem_est = fixed_vmem + tb * per_row
    vmem_limit = int(min(max(vmem_est + (8 << 20), 32 << 20), vmem_cap))

    # Advisory cost so XLA schedules the custom call sensibly in a larger graph.
    cost = pl.CostEstimate(
        flops=2 * B * (in_feats * hidden + hidden * out_feats),
        transcendentals=0,
        bytes_accessed=int(x_itemsize * B * in_feats
                           + w_itemsize * (in_feats * hp + hp * out_feats)
                           + 4 * (hp + out_feats)
                           + out_itemsize * B * out_feats))

    compiler_params = pltpu.CompilerParams(
        dimension_semantics=("parallel",),        # shard batch tiles across TCs (v7x)
        vmem_limit_bytes=vmem_limit)

    x_spec = _make_spec((tb, in_feats), lambda i: (i, 0), buffers=x_buffers)
    w0_spec = _make_spec((in_feats, hp), lambda i: (0, 0), buffers=1)   # resident, 1 buffer
    b0_spec = _make_spec((1, hp), lambda i: (0, 0), buffers=1)

    if out_feats == 1:
        w1t = w1.T  # (1, hp) row
        out_row_arr = pl.pallas_call(
            _mlp_kernel_out1,
            out_shape=jax.ShapeDtypeStruct((1, bp), out_dtype),
            grid=(num_tiles,),
            in_specs=[
                x_spec,
                w0_spec,
                b0_spec,
                _make_spec((1, hp), lambda i: (0, 0), buffers=1),
                _make_spec((1, 1), lambda i: (0, 0), buffers=1),
            ],
            out_specs=pl.BlockSpec((1, tb), lambda i: (0, i)),
            compiler_params=compiler_params,
            cost_estimate=cost,
        )(x, w0, b0, w1t, b1)
        return out_row_arr.reshape(bp, 1)[:B]

    out = pl.pallas_call(
        _mlp_kernel_general,
        out_shape=jax.ShapeDtypeStruct((bp, out_feats), out_dtype),
        grid=(num_tiles,),
        in_specs=[
            x_spec,
            w0_spec,
            b0_spec,
            _make_spec((hp, out_feats), lambda i: (0, 0), buffers=1),
            _make_spec((1, out_feats), lambda i: (0, 0), buffers=1),
        ],
        out_specs=pl.BlockSpec((tb, out_feats), lambda i: (i, 0)),
        compiler_params=compiler_params,
        cost_estimate=cost,
    )(x, w0, b0, w1, b1)
    return out[:B]


def init_params(key, in_feats, hidden_feats, out_feats, dtype=jnp.float32):
    """Deterministic Xavier-uniform weights, zero biases (matches reset_parameters)."""
    k0, k1 = jax.random.split(key)

    def xavier(k, fan_in, fan_out):
        limit = jnp.sqrt(6.0 / (fan_in + fan_out))
        # stored already transposed: (in, out)
        return jax.random.uniform(k, (fan_in, fan_out), dtype=dtype,
                                  minval=-limit, maxval=limit)

    w0 = xavier(k0, in_feats, hidden_feats)
    b0 = jnp.zeros((1, hidden_feats), dtype=dtype)
    w1 = xavier(k1, hidden_feats, out_feats)
    b1 = jnp.zeros((1, out_feats), dtype=dtype)
    return w0, b0, w1, b1


def reference_mlp(x, w0, b0, w1, b1):
    h = jnp.maximum(x @ w0 + b0, 0.0)
    return h @ w1 + b1


if __name__ == "__main__":
    key = jax.random.PRNGKey(0)
    k_x, k_p, k_x2, k_p2 = jax.random.split(key, 4)

    # 1) Default module config (regression head, out_feats=1), small single-tile batch.
    B, IN_FEATS, HIDDEN, OUT_FEATS = 8, 16, 32, 1
    x = jax.random.normal(k_x, (B, IN_FEATS), dtype=jnp.float32)
    w0, b0, w1, b1 = init_params(k_p, IN_FEATS, HIDDEN, OUT_FEATS)

    y = jax.block_until_ready(mlp_forward(x, w0, b0, w1, b1))
    y_ref = reference_mlp(x, w0, b0, w1, b1)
    assert y.shape == (B, OUT_FEATS)
    assert jnp.allclose(y, y_ref, atol=1e-5, rtol=1e-5), "f32 mismatch vs reference"

    # 2) Multi-tile grid (forced tile_b=128 -> 3 tiles, padded) + lane-dense output slab.
    B2 = 300
    x2 = jax.random.normal(k_x2, (B2, IN_FEATS), dtype=jnp.float32)
    y2 = jax.block_until_ready(mlp_forward(x2, w0, b0, w1, b1, tile_b=128))
    y2_ref = reference_mlp(x2, w0, b0, w1, b1)
    assert y2.shape == (B2, OUT_FEATS)
    assert jnp.allclose(y2, y2_ref, atol=1e-5, rtol=1e-5), "gridded f32 mismatch"

    # 3) Auto (byte-sized) tile selection.
    y2a = jax.block_until_ready(mlp_forward(x2, w0, b0, w1, b1))
    assert jnp.allclose(y2a, y2_ref, atol=1e-5, rtol=1e-5), "auto-tile mismatch"

    # 4) Opt-in bf16 weights (x cast in-kernel); f32 accumulate/output.
    y2_bf16 = jax.block_until_ready(
        mlp_forward(x2, w0, b0, w1, b1, tile_b=128, compute_dtype=jnp.bfloat16))
    assert jnp.allclose(y2_bf16, y2_ref, atol=1e-1, rtol=1e-1), "bf16 mismatch"

    # 5) Generic head (out_feats > 1, e.g. softmax classification logits).
    w0c, b0c, w1c, b1c = init_params(k_p2, IN_FEATS, HIDDEN, 4)
    yc = jax.block_until_ready(mlp_forward(x2, w0c, b0c, w1c, b1c, tile_b=128))
    yc_ref = reference_mlp(x2, w0c, b0c, w1c, b1c)
    assert yc.shape == (B2, 4)
    assert jnp.allclose(yc, yc_ref, atol=1e-5, rtol=1e-5), "multi-output mismatch"

    print("KERNEL_OK")
</pallas_src>

<mosaic_0001>
module attributes {stable_mosaic.version = 11 : i64} {
  func.func @_mlp_kernel_out1(%arg0: i32, %arg1: memref<8x16xf32, #tpu.memory_space<vmem>>, %arg2: memref<16x128xf32, #tpu.memory_space<vmem>>, %arg3: memref<1x128xf32, #tpu.memory_space<vmem>>, %arg4: memref<1x128xf32, #tpu.memory_space<vmem>>, %arg5: memref<1x1xf32, #tpu.memory_space<vmem>>, %arg6: memref<1x8xf32, #tpu.memory_space<vmem>>) attributes {dimension_semantics = [#tpu.dimension_semantics<parallel>], iteration_bounds = array<i64: 1>, scalar_prefetch = 0 : i64, scratch_operands = 0 : i64, tpu.core_type = #tpu.core_type<tc>, window_params = [{transform_indices = @transform_0, window_bounds = array<i64: 8, 16>}, {pipeline_mode = #tpu.pipeline_mode<synchronous>, transform_indices = @transform_1, window_bounds = array<i64: 16, 128>}, {pipeline_mode = #tpu.pipeline_mode<synchronous>, transform_indices = @transform_2, window_bounds = array<i64: 1, 128>}, {pipeline_mode = #tpu.pipeline_mode<synchronous>, transform_indices = @transform_3, window_bounds = array<i64: 1, 128>}, {pipeline_mode = #tpu.pipeline_mode<synchronous>, transform_indices = @transform_4, window_bounds = array<i64: 1, 1>}, {transform_indices = @transform_5, window_bounds = array<i64: 1, 8>}]} {
    %c0 = arith.constant 0 : index
    %c0_0 = arith.constant 0 : index
    %0 = vector.load %arg1[%c0, %c0_0] : memref<8x16xf32, #tpu.memory_space<vmem>>, vector<8x16xf32>
    %c0_1 = arith.constant 0 : index
    %c0_2 = arith.constant 0 : index
    %1 = vector.load %arg2[%c0_1, %c0_2] : memref<16x128xf32, #tpu.memory_space<vmem>>, vector<16x128xf32>
    %cst = arith.constant dense<0.000000e+00> : vector<8x128xf32>
    %2 = tpu.matmul %0, %1, %cst {dimension_numbers = #tpu.dot_dimension_numbers<[1], [0], [0], [1], [0, 0, 1, 1], [], []>} : vector<8x16xf32>, vector<16x128xf32>, vector<8x128xf32> -> vector<8x128xf32>
    %c0_3 = arith.constant 0 : index
    %c0_4 = arith.constant 0 : index
    %3 = vector.load %arg3[%c0_3, %c0_4] : memref<1x128xf32, #tpu.memory_space<vmem>>, vector<1x128xf32>
    %4 = vector.broadcast %3 : vector<1x128xf32> to vector<8x128xf32>
    %5 = arith.addf %2, %4 : vector<8x128xf32>
    %cst_5 = arith.constant 0.000000e+00 : f32
    %6 = vector.broadcast %cst_5 : f32 to vector<8x128xf32>
    %7 = arith.maximumf %5, %6 : vector<8x128xf32>
    %c0_6 = arith.constant 0 : index
    %c0_7 = arith.constant 0 : index
    %8 = vector.load %arg4[%c0_6, %c0_7] : memref<1x128xf32, #tpu.memory_space<vmem>>, vector<1x128xf32>
    %cst_8 = arith.constant dense<0.000000e+00> : vector<1x8xf32>
    %9 = tpu.matmul %8, %7, %cst_8 {dimension_numbers = #tpu.dot_dimension_numbers<[1], [1], [0], [0], [0, 0, 1, 0], [], []>} : vector<1x128xf32>, vector<8x128xf32>, vector<1x8xf32> -> vector<1x8xf32>
    %c0_9 = arith.constant 0 : index
    %c0_10 = arith.constant 0 : index
    %10 = vector.load %arg5[%c0_9, %c0_10] : memref<1x1xf32, #tpu.memory_space<vmem>>, vector<1x1xf32>
    %11 = vector.broadcast %10 : vector<1x1xf32> to vector<1x8xf32>
    %12 = arith.addf %9, %11 : vector<1x8xf32>
    %c0_11 = arith.constant 0 : index
    %c0_12 = arith.constant 0 : index
    %13 = vector.load %arg6[%c0_11, %c0_12] : memref<1x8xf32, #tpu.memory_space<vmem>>, vector<1x8xf32>
    tpu.vector_store %arg6[%c0_11, %c0_12], %12 {strides = array<i32>} : memref<1x8xf32, #tpu.memory_space<vmem>>, vector<1x8xf32>,
    return
  }
  func.func @transform_0(%arg0: i32) -> (i32, i32) {
    %c0_i32 = arith.constant 0 : i32
    %c0_i32_0 = arith.constant 0 : i32
    return %arg0, %c0_i32 : i32, i32
  }
  func.func @transform_1(%arg0: i32) -> (i32, i32) {
    %c0_i32 = arith.constant 0 : i32
    %c0_i32_0 = arith.constant 0 : i32
    %c0_i32_1 = arith.constant 0 : i32
    return %c0_i32, %c0_i32_0 : i32, i32
  }
  func.func @transform_2(%arg0: i32) -> (i32, i32) {
    %c0_i32 = arith.constant 0 : i32
    %c0_i32_0 = arith.constant 0 : i32
    %c0_i32_1 = arith.constant 0 : i32
    return %c0_i32, %c0_i32_0 : i32, i32
  }
  func.func @transform_3(%arg0: i32) -> (i32, i32) {
    %c0_i32 = arith.constant 0 : i32
    %c0_i32_0 = arith.constant 0 : i32
    %c0_i32_1 = arith.constant 0 : i32
    return %c0_i32, %c0_i32_0 : i32, i32
  }
  func.func @transform_4(%arg0: i32) -> (i32, i32) {
    %c0_i32 = arith.constant 0 : i32
    %c0_i32_0 = arith.constant 0 : i32
    %c0_i32_1 = arith.constant 0 : i32
    return %c0_i32, %c0_i32_0 : i32, i32
  }
  func.func @transform_5(%arg0: i32) -> (i32, i32) {
    %c0_i32 = arith.constant 0 : i32
    %c0_i32_0 = arith.constant 0 : i32
    return %c0_i32, %arg0 : i32, i32
  }
}

</mosaic_0001>

<bundles_post_ra>
// kernel: tpu_custom_call.1
= control target key start
LH: loop header
LB: loop body
LE: loop exit
PB: predicated region body
PF: predicated region fallthrough
CT: control target
= control target key end

     0   :  { %s428_s0 = inlined_call_operand.hbm [shape: f32[8,16], index: 0, kind: input, shape index: {}]   ;;  %s429_s1 = inlined_call_operand.hbm [shape: f32[16,128], index: 1, kind: input, shape index: {}]   ;;  %s430_s2 = inlined_call_operand.vmem [shape: f32[1,128], index: 2, kind: input, shape index: {}]   ;;  %s431_s3 = inlined_call_operand.vmem [shape: f32[1,128], index: 3, kind: input, shape index: {}]   ;;  %s432_s4 = inlined_call_operand.<no memory space> [shape: f32[1,1], index: 4, kind: input, shape index: {}]   ;;  %s433_s5 = inlined_call_operand.hbm [shape: f32[1,8], index: 5, kind: output, shape index: {}]  }
   0x1   :  { %v10_v0 = vstv %s432_s4 }
   0x2   :  { %11 = vst [vmem:[#allocation2] sm:$0x1] %v10_v0 }
   0x3   :  { %12 = vsyncpa [#allocation4], 0 }
   0x4   :  { %13 = vsyncpa [#allocation7], 0 }
   0x5   :  { %14 = vsyncpa [#allocation5], 0  ;;  %s337_s20 = smov [#allocation3]   ;;  %s338_s22 = smov [#allocation6]  }
   0x6   :  { %s21_s21 = sshll.u32 %s337_s20, 4  ;;  %s30_s23 = sshll.u32 %s338_s22, 4  ;;  %s22_s21 = int_to_ptr.vmem [resolvable:$true] %s21_s21  ;;  %s379_s23 = int_to_ptr.vmem [resolvable:$true] %s30_s23 }
   0x7   :  { %s265_s26 = scalar_lea.hbm %s428_s0, 128 }
   0x8   :  { %p266_p0 = scmp.ne.s32.totalorder %s428_s0, %s265_s26  ;;  %p269_p1 = scmp.lt.u32.totalorder %s265_s26, %s428_s0 }
   0xa   :  { %p271_p2 = pnand %p269_p1, %p266_p0 }
   0xc   :  { %274 = shalt.err (!%p271_p2)
}
   0xd   :  { %s275_s30 = scalar_lea.vmem %s22_s21, 128  ;;  %p280_p4 = scmp.lt.s32.totalorder %s22_s21, %s22_s21 }
   0xe   :  { %p276_p3 = scmp.ne.s32.totalorder %s22_s21, %s275_s30  ;;  %p281_p5 = scmp.lt.s32.totalorder %s275_s30, %s275_s30 }
  0x10   :  { %p282_p6 = por %p281_p5, %p280_p4 }
  0x12   :  { %p283_p7 = pnand %p282_p6, %p276_p3 }
  0x14   :  { %286 = shalt.err (!%p283_p7)
}
  0x15   :  { %24 = dma.hbm_to_vmem [thread:$0]  %s428_s0, 128, %s22_s21, [#allocation4]  }
  0x16   :  { %s287_s10 = scalar_lea.hbm %s429_s1, 256 }
  0x17   :  { %p288_p8 = scmp.ne.s32.totalorder %s429_s1, %s287_s10  ;;  %p291_p9 = scmp.lt.u32.totalorder %s287_s10, %s429_s1 }
  0x19   :  { %p293_p10 = pnand %p291_p9, %p288_p8 }
  0x1b   :  { %296 = shalt.err (!%p293_p10)
}
  0x1c   :  { %s297_s15 = scalar_lea.vmem %s379_s23, 256  ;;  %p302_p12 = scmp.lt.s32.totalorder %s379_s23, %s379_s23 }
  0x1d   :  { %p298_p11 = scmp.ne.s32.totalorder %s379_s23, %s297_s15  ;;  %p303_p13 = scmp.lt.s32.totalorder %s297_s15, %s297_s15 }
  0x1f   :  { %p304_p0 = por %p303_p13, %p302_p12 }
  0x21   :  { %p305_p1 = pnand %p304_p0, %p298_p11 }
  0x23   :  { %308 = shalt.err (!%p305_p1)
}
  0x24   :  { %s339_s0 = smov 128   ;;  %s340_s16 = smov 8  }
  0x25   :  { %36 = dma.hbm_to_vmem [thread:$0]  %s429_s1, 256, %s379_s23, [#allocation7], %s339_s0, %s339_s0, %s340_s16  }
  0x26   :  { %331 = dma.done.wait [#allocation4], 128  }
  0x27   :  { %332 = vsyncadd [#allocation4], 4294967168 }
  0x28   :  { %333 = dma.done.wait [#allocation7], 256  }
  0x29   :  { %334 = vsyncadd [#allocation7], 4294967040  ;;  %v341_v1 = vmov 0.0|0.0   ;;  %vm342_vm0 = vmmov 0   ;;  %v343_v2 = vmov 0.0   ;;  %v50_v3 = vld [vmem:[#allocation6] sm:$0xff]  ;;  %v141_v15 = vlaneseq }
  0x2a   :  { %252 = vmatprep.subr.bf16.mxu0 %v341_v1  ;;  %244 = vmatprep.mubr.msk.f32.mxu0 %vm342_vm0, %v343_v2  ;;  %v51_v4 = vld [vmem:[#allocation6 + $0x8] sm:$0xff]  ;;  %v49_v6 = vld [vmem:[#allocation3] sm:$0xff]  ;;  %vm59_vm1 = vcmask 130048   ;;  %v135_v7 = vld [vmem:[#allocation2] sm:$0x1]  ;;  %v344_v8 = vmov 0  }
  0x2b   :  { %247 = vmatprep.subr.mxu1 %v343_v2  ;;  %249 = vmatprep.mubr.msk.f32.mxu1 %vm342_vm0, %v343_v2  ;;  %v253_v5 = vpack.c.bf16 %v51_v4, %v50_v3  ;;  %v233_v9 = vld [vmem:[%s430_s2] ss:$0 sm:$0xff]  ;;  %v142_v16 = vshrl.u32 %v141_v15, 7  ;;  %s345_s22 = smov [#allocation8]   ;;  %vm215_vm2 = vcmask 57344  }
  0x2c   :  { %264 = vset.pattern.permute.xlu0 %v344_v8  ;;  %v134_v14 = vld [vmem:[%s431_s3] sm:$0x1]  ;;  %s223_s23 = sshll.u32 %s345_s22, 4  ;;  %s224_s23 = int_to_ptr.vmem [resolvable:$true] %s223_s23 }
  0x2d   :  { %254 = vmatpush3.bf16.msra.mxu0 %v253_v5  ;;  %138 = vperm.xlu0 %264, %v135_v7   ;;  %v143_v17 = vsub.s32 0, %v142_v16  ;;  %s309_s2 = scalar_lea.vmem %s224_s23, 16  ;;  %s313_s24 = scalar_lea.vmem %s224_s23, 32 }
  0x2e   :  { %p310_p2 = scmp.ne.s32.totalorder %s224_s23, %s309_s2  ;;  %p314_p3 = scmp.lt.s32.totalorder %s224_s23, %s224_s23 }
  0x2f   :  { %p315_p4 = scmp.lt.s32.totalorder %s313_s24, %s309_s2 }
  0x30   :  { %245 = vmatmul.mubr.msk.f32.vlgmr.msra.gmra.mrb[0].mxu0 %vm59_vm1, %v49_v6 }
  0x31   :  { %p316_p5 = por %p315_p4, %p314_p3 }
  0x33   :  { %p317_p6 = pnand %p316_p5, %p310_p2 }
  0xac   :  { %v139_v18 = vpop.permute.xlu0 %138 }
  0xad   :  { %v144_v19 = vrot.slane %v139_v18, %v143_v17 }
 0x103   :  { %v129_v10 = vpop.f32.mrb[0].mxu0 }
 0x104   :  { %v130_v11 = vadd.f32 %v233_v9, %v129_v10  ;;  %v246_v12 = vpop.f32.mrb[1].mxu0 }
 0x106   :  { %v133_v13 = vmax.f32 %v130_v11, 0.0 }
 0x108   :  { %248 = vmatpush3.xpose.msra.mxu1 %v133_v13 }
 0x10b   :  { %250 = vmatmul.mubr.f32.vlgmr.msra.gmra.mrb[0].mxu1 %v134_v14 }
 0x1de   :  { %v211_v20 = vpop.f32.mrb[0].mxu1 }
 0x1df   :  { %v212_v21 = vadd.f32 %v211_v20, %v144_v19  ;;  %v251_v22 = vpop.f32.mrb[1].mxu1 }
 0x1e1   :  { %216 = vst.msk [vmem:[#allocation8] sm:$0x1] %vm215_vm2, %v212_v21 }
 0x1e2   :  { %320 = shalt.err (!%p317_p6)
}
 0x1e3   :  { %s321_s26 = scalar_lea.hbm %s433_s5, 16 }
 0x1e4   :  { %p322_p7 = scmp.ne.s32.totalorder %s433_s5, %s321_s26  ;;  %p325_p8 = scmp.lt.u32.totalorder %s321_s26, %s433_s5 }
 0x1e6   :  { %p327_p9 = pnand %p325_p8, %p322_p7 }
 0x1e8   :  { %330 = shalt.err (!%p327_p9)
}
 0x1e9   :  { %226 = dma.vmem_to_hbm [thread:$0]  %s224_s23, 16, %s433_s5, [#allocation5]  }
 0x1ea   :  { %335 = dma.done.wait [#allocation5], 16  }
 0x1eb   :  { %336 = vsyncadd [#allocation5], 4294967280 }
 0x1ec   :  { %230 = vsyncpa [#allocation4], 1 }
 0x1ed   :  { %231 = vsyncpa [#allocation7], 1 }
 0x1ee   :  { %232 = vsyncpa [#allocation5], 1 }

</bundles_post_ra>
